<compile_context>
chip_gen: v6e
topology: v6e:2x2x1
jax: 0.10.0
libtpu: 0.0.40
codegen_flags: <defaults>
</compile_context>

<pallas_src>
import jax
import jax.numpy as jnp
from jax import lax
from jax.experimental import pallas as pl
from jax.experimental.pallas import tpu as pltpu


# ----------------------------------------------------------------------------
# Kernel 1: fused q_sample + denoiser + MSE accumulation (batch folded into rows)
# ----------------------------------------------------------------------------
def _cardiff_loss_kernel(x_ref, noise_ref, a_ref, s_ref, t_ref, m_ref,
                         w_ref, tvec_ref,          # VMEM inputs
                         out_ref,                  # (1, D) per-column sums
                         acc_ref):                 # VMEM scratch accumulator
    i = pl.program_id(0)

    @pl.when(i == 0)
    def _():
        acc_ref[...] = jnp.zeros_like(acc_ref)

    x = x_ref[...].astype(jnp.float32)             # (TM, D)
    n = noise_ref[...].astype(jnp.float32)         # (TM, D)

    # GaussianDiffusion.q_sample  (elementwise in f32; bf16 only for DMA/MXU)
    x_noisy = a_ref[...] * x + s_ref[...] * n

    # TODO(synk): the real denoiser is an external Unet passed into __init__
    # (attr_embeds conditioning / cond_drop_prob).  A deterministic
    # linear + time-embedding + tanh stand-in keeps the matmul hot path in-kernel.
    h = jnp.dot(x_noisy.astype(jnp.bfloat16), w_ref[...],
                preferred_element_type=jnp.float32)            # MXU, f32 acc
    pred = jnp.tanh(h + t_ref[...] * tvec_ref[...])

    # l2 loss: per-column partial sums of squared error (pad rows masked out)
    err = (pred - n) * m_ref[...]
    acc_ref[...] += jnp.sum(err * err, axis=0, keepdims=True)  # (1, D)

    @pl.when(i == pl.num_programs(0) - 1)
    def _():
        out_ref[...] = acc_ref[...]                            # single store


def cardiff_diffusion_loss(x_start, noise, times, sqrt_acp, sqrt_omacp, w, tvec,
                           num_timesteps, row_tile=1024):
    B, L, D = x_start.shape
    R = B * L

    # Per-row coefficients (row r = b*L + l  ->  batch b).
    coef_a = jnp.repeat(sqrt_acp[times].astype(jnp.float32), L)                # (R,)
    coef_s = jnp.repeat(sqrt_omacp[times].astype(jnp.float32), L)              # (R,)
    coef_t = jnp.repeat(times.astype(jnp.float32) / float(num_timesteps), L)   # (R,)

    # Row tile: as large as possible, multiple of 8 sublanes.
    if R >= row_tile:
        tm = row_tile
    else:
        tm = ((R + 7) // 8) * 8
    num_tiles = -(-R // tm)
    r_pad = num_tiles * tm
    pad = r_pad - R

    x2 = x_start.reshape(R, D).astype(jnp.bfloat16)
    n2 = noise.reshape(R, D).astype(jnp.bfloat16)
    if pad:
        x2 = jnp.pad(x2, ((0, pad), (0, 0)))
        n2 = jnp.pad(n2, ((0, pad), (0, 0)))
        coef_a = jnp.pad(coef_a, (0, pad))
        coef_s = jnp.pad(coef_s, (0, pad))
        coef_t = jnp.pad(coef_t, (0, pad))
    mask = (jnp.arange(r_pad) < R).astype(jnp.float32)

    grid_spec = pltpu.PrefetchScalarGridSpec(
        num_scalar_prefetch=0,
        grid=(num_tiles,),
        in_specs=[
            pl.BlockSpec((tm, D), lambda i: (i, 0)),   # x_start rows (bf16)
            pl.BlockSpec((tm, D), lambda i: (i, 0)),   # noise rows (bf16)
            pl.BlockSpec((tm, 1), lambda i: (i, 0)),   # sqrt(alphas_cumprod)[t] per row
            pl.BlockSpec((tm, 1), lambda i: (i, 0)),   # sqrt(1-alphas_cumprod)[t] per row
            pl.BlockSpec((tm, 1), lambda i: (i, 0)),   # normalized timestep per row
            pl.BlockSpec((tm, 1), lambda i: (i, 0)),   # pad-row mask
            pl.BlockSpec((D, D), lambda i: (0, 0)),    # denoiser weight (bf16)
            pl.BlockSpec((1, D), lambda i: (0, 0)),    # time embedding vector (f32)
        ],
        out_specs=pl.BlockSpec((1, D), lambda i: (0, 0)),
        scratch_shapes=[pltpu.VMEM((1, D), jnp.float32)],
    )
    # TODO(synk): on v7x a further 2x would come from splitting the reduction
    # across the two TensorCores (per-core partial-output slots + "parallel").
    col_sums = pl.pallas_call(
        _cardiff_loss_kernel,
        out_shape=jax.ShapeDtypeStruct((1, D), jnp.float32),
        grid_spec=grid_spec,
        compiler_params=pltpu.CompilerParams(
            dimension_semantics=("arbitrary",),
            vmem_limit_bytes=32 * 1024 * 1024),
    )(x2, n2, coef_a[:, None], coef_s[:, None], coef_t[:, None], mask[:, None],
      w.astype(jnp.bfloat16), tvec.astype(jnp.float32))
    return jnp.sum(col_sums) / float(R * D)


# ----------------------------------------------------------------------------
# Kernel 2: structure_loss_from_logits (whole batch folded into one block)
# ----------------------------------------------------------------------------
def _structure_loss_kernel(logits_ref, adj_ref, shift_ref, out_ref, acc_ref):
    i = pl.program_id(0)

    @pl.when(i == 0)
    def _():
        acc_ref[...] = jnp.zeros_like(acc_ref)

    logits = logits_ref[...]                                   # (Rt, V) f32
    Rt, V = logits.shape

    # argmax over vocab (first occurrence, matching torch/jnp argmax)
    m = jnp.max(logits, axis=-1, keepdims=True)
    iota = lax.broadcasted_iota(jnp.int32, (Rt, V), 1)
    ids = jnp.min(jnp.where(logits == m, iota, V), axis=-1, keepdims=True)
    onehot = (iota == ids).astype(jnp.bfloat16)                # exact 0/1

    # next-position one-hots via a block-diagonal shift matmul (MXU); rows at
    # batch boundaries are zeroed by the shift matrix -> keeps (8,128)-aligned
    # shapes, no unaligned [:-1]/[1:] sublane slices.
    tgt = jnp.dot(shift_ref[...], onehot, preferred_element_type=jnp.float32)   # (Rt, V)
    trans = jnp.dot(onehot, adj_ref[...], preferred_element_type=jnp.float32)   # (Rt, V)
    acc_ref[...] += jnp.sum(trans * tgt)                       # count of VALID transitions

    @pl.when(i == pl.num_programs(0) - 1)
    def _():
        out_ref[...] = acc_ref[...]


def structure_loss_from_logits(logits, adjacency_bool, batch_tile=None):
    B, L, V = logits.shape
    bt = batch_tile if (batch_tile is not None and B % batch_tile == 0) else B
    Rt = bt * L
    R = B * L
    num_tiles = R // Rt

    logits2 = logits.reshape(R, V).astype(jnp.float32)
    adj_bf = adjacency_bool.astype(jnp.bfloat16)               # exact 0/1, half the DMA bytes

    # Block-diagonal "next position within the same batch item" shift matrix.
    rows = jnp.arange(Rt)
    shift = ((rows[None, :] == rows[:, None] + 1) &
             (((rows[:, None] + 1) % L) != 0)).astype(jnp.bfloat16)   # (Rt, Rt)

    grid_spec = pltpu.PrefetchScalarGridSpec(
        num_scalar_prefetch=0,
        grid=(num_tiles,),
        in_specs=[
            pl.BlockSpec((Rt, V), lambda i: (i, 0)),
            pl.BlockSpec((V, V), lambda i: (0, 0)),
            pl.BlockSpec((Rt, Rt), lambda i: (0, 0)),
        ],
        out_specs=pl.BlockSpec((1, 1), lambda i: (0, 0)),
        scratch_shapes=[pltpu.VMEM((1, 1), jnp.float32)],
    )
    total_valid = pl.pallas_call(
        _structure_loss_kernel,
        out_shape=jax.ShapeDtypeStruct((1, 1), jnp.float32),
        grid_spec=grid_spec,
        compiler_params=pltpu.CompilerParams(
            dimension_semantics=("arbitrary",),
            vmem_limit_bytes=32 * 1024 * 1024),
    )(logits2, adj_bf, shift)[0, 0]

    n_trans = float(B * (L - 1))
    return (n_trans - total_valid) / n_trans


# ----------------------------------------------------------------------------
# Cardiff forward (denoiser_number=1, use_p_loss=True path)
# ----------------------------------------------------------------------------
class CardiffPallas:
    def __init__(self, *, first_stage_dim=32, first_stage_len=8, second_stage_len=16,
                 channels=2, timesteps=50, loss_type="l2",
                 structure_loss_percent=0.0, structure_loss_weight=0.01, seed=0):
        assert loss_type == "l2"
        self.channels = channels
        self.first_stage_dim = first_stage_dim
        self.first_stage_len = first_stage_len
        self.second_stage_len = second_stage_len
        self.num_timesteps = timesteps
        self.structure_loss_percent = structure_loss_percent
        self.structure_loss_weight = structure_loss_weight

        # GaussianDiffusion linear beta schedule (deterministic)
        betas = jnp.linspace(1e-4, 0.02, timesteps, dtype=jnp.float32)
        alphas_cumprod = jnp.cumprod(1.0 - betas)
        self.sqrt_acp = jnp.sqrt(alphas_cumprod)
        self.sqrt_omacp = jnp.sqrt(1.0 - alphas_cumprod)

        # Deterministic stand-in denoiser parameters (D -> D linear + time vec)
        k1, k2 = jax.random.split(jax.random.PRNGKey(seed))
        D = first_stage_dim
        self.denoiser_w = (jax.random.normal(k1, (D, D), jnp.float32)
                           / jnp.sqrt(jnp.float32(D)))
        self.denoiser_tvec = jax.random.normal(k2, (1, D), jnp.float32)

    def forward(self, trajs, attr_embeds=None, segment_embeds=None,
                denoiser_number=1, use_p_loss=True, labels=None, rng=None):
        assert denoiser_number == 1
        b, c, h = trajs.shape
        assert c == self.channels, "check_shape(trajs, 'b c h', c=channels)"
        rng = jax.random.PRNGKey(0) if rng is None else rng
        k_t, k_n = jax.random.split(rng)

        # noise_scheduler._sample_random_times
        times = jax.random.randint(k_t, (b,), 0, self.num_timesteps, dtype=jnp.int32)

        # denoiser_index == 0  ->  x_start = segment_embeds
        x_start = segment_embeds
        noise = jax.random.normal(k_n, x_start.shape, x_start.dtype)

        # fused q_sample + denoiser + l2 loss (Pallas kernel)
        diffusion_loss = cardiff_diffusion_loss(
            x_start, noise, times, self.sqrt_acp, self.sqrt_omacp,
            self.denoiser_w, self.denoiser_tvec, self.num_timesteps)

        # structure-loss branch: with the default config (structure_loss_percent=0,
        # lm=None) the mask `times >= num_timesteps` is always empty, so the
        # external-LM re-decode is never invoked and structure_loss == 0.
        # TODO(synk): the LM re-decode (self.lm(...)) is an external HF model and
        # is not translatable here; structure_loss_from_logits itself IS a Pallas
        # kernel (demonstrated standalone in __main__).
        structure_loss = jnp.float32(0.0)
        return diffusion_loss + self.structure_loss_weight * structure_loss


# ----------------------------------------------------------------------------
if __name__ == "__main__":
    B, C, H = 2, 2, 16           # trajs: (b, c, h)
    L, D = 8, 32                 # segment_embeds: (b, first_stage_len, first_stage_dim)
    V = 32                       # vocab size for structure-loss demo

    key = jax.random.PRNGKey(0)
    k_trajs, k_seg, k_attr, k_logits, k_adj, k_fwd = jax.random.split(key, 6)

    trajs = jax.random.normal(k_trajs, (B, C, H), jnp.float32)
    segment_embeds = jax.random.normal(k_seg, (B, L, D), jnp.float32)
    attr_embeds = jax.random.normal(k_attr, (B, D), jnp.float32)  # consumed by external Unet only

    model = CardiffPallas(first_stage_dim=D, first_stage_len=L, second_stage_len=H,
                          channels=C, timesteps=50)

    loss = model.forward(trajs, attr_embeds=attr_embeds, segment_embeds=segment_embeds,
                         denoiser_number=1, use_p_loss=True, rng=k_fwd)
    loss = jax.block_until_ready(loss)

    # Pure-JAX reference mirroring the kernel's bf16 operand path
    k_t, k_n = jax.random.split(k_fwd)
    times = jax.random.randint(k_t, (B,), 0, model.num_timesteps, dtype=jnp.int32)
    noise = jax.random.normal(k_n, segment_embeds.shape, jnp.float32)
    a = model.sqrt_acp[times][:, None, None]
    s = model.sqrt_omacp[times][:, None, None]
    tf = (times.astype(jnp.float32) / model.num_timesteps)[:, None, None]
    xb = segment_embeds.astype(jnp.bfloat16).astype(jnp.float32)
    nb = noise.astype(jnp.bfloat16).astype(jnp.float32)
    x_noisy = a * xb + s * nb
    wb = model.denoiser_w.astype(jnp.bfloat16).astype(jnp.float32)
    h = jnp.einsum("bld,de->ble", x_noisy.astype(jnp.bfloat16).astype(jnp.float32),
                   wb, precision=jax.lax.Precision.HIGHEST)
    pred_ref = jnp.tanh(h + tf * model.denoiser_tvec)
    loss_ref = jnp.mean((pred_ref - nb) ** 2)
    assert abs(float(loss) - float(loss_ref)) < 1e-3, (float(loss), float(loss_ref))

    # Standalone demo + check of the structure_loss_from_logits Pallas kernel
    logits = jax.random.normal(k_logits, (B, L, V), jnp.float32)
    adjacency = jax.random.bernoulli(k_adj, 0.5, (V, V))
    s_loss = jax.block_until_ready(structure_loss_from_logits(logits, adjacency))
    ids = jnp.argmax(logits, axis=-1)
    s_ref = jnp.mean((~adjacency[ids[:, :-1], ids[:, 1:]]).astype(jnp.float32))
    assert abs(float(s_loss) - float(s_ref)) < 1e-5, (float(s_loss), float(s_ref))

    print("KERNEL_OK")
</pallas_src>

<mosaic_0001>
module attributes {stable_mosaic.version = 11 : i64} {
  func.func @_cardiff_loss_kernel(%arg0: i32, %arg1: memref<16x32xbf16, #tpu.memory_space<vmem>>, %arg2: memref<16x32xbf16, #tpu.memory_space<vmem>>, %arg3: memref<16x1xf32, #tpu.memory_space<vmem>>, %arg4: memref<16x1xf32, #tpu.memory_space<vmem>>, %arg5: memref<16x1xf32, #tpu.memory_space<vmem>>, %arg6: memref<16x1xf32, #tpu.memory_space<vmem>>, %arg7: memref<32x32xbf16, #tpu.memory_space<vmem>>, %arg8: memref<1x32xf32, #tpu.memory_space<vmem>>, %arg9: memref<1x32xf32, #tpu.memory_space<vmem>>, %arg10: memref<1x32xf32, #tpu.memory_space<vmem>>) attributes {dimension_semantics = [#tpu.dimension_semantics<arbitrary>], iteration_bounds = array<i64: 1>, scalar_prefetch = 0 : i64, scratch_operands = 1 : i64, tpu.core_type = #tpu.core_type<tc>, window_params = [{transform_indices = @transform_0, window_bounds = array<i64: 16, 32>}, {transform_indices = @transform_1, window_bounds = array<i64: 16, 32>}, {transform_indices = @transform_2, window_bounds = array<i64: 16, 1>}, {transform_indices = @transform_3, window_bounds = array<i64: 16, 1>}, {transform_indices = @transform_4, window_bounds = array<i64: 16, 1>}, {transform_indices = @transform_5, window_bounds = array<i64: 16, 1>}, {pipeline_mode = #tpu.pipeline_mode<synchronous>, transform_indices = @transform_6, window_bounds = array<i64: 32, 32>}, {pipeline_mode = #tpu.pipeline_mode<synchronous>, transform_indices = @transform_7, window_bounds = array<i64: 1, 32>}, {pipeline_mode = #tpu.pipeline_mode<synchronous>, transform_indices = @transform_8, window_bounds = array<i64: 1, 32>}]} {
    %c0_i32 = arith.constant 0 : i32
    %0 = arith.cmpi eq, %arg0, %c0_i32 : i32
    %1 = arith.extui %0 : i1 to i32
    %c0_i32_0 = arith.constant 0 : i32
    %2 = arith.cmpi ne, %1, %c0_i32_0 : i32
    scf.if %2 {
      %cst_23 = arith.constant 0.000000e+00 : f32
      %37 = vector.broadcast %cst_23 : f32 to vector<1x32xf32>
      %c0_24 = arith.constant 0 : index
      %c0_25 = arith.constant 0 : index
      %38 = vector.load %arg10[%c0_24, %c0_25] : memref<1x32xf32, #tpu.memory_space<vmem>>, vector<1x32xf32>
      tpu.vector_store %arg10[%c0_24, %c0_25], %37 {strides = array<i32>} : memref<1x32xf32, #tpu.memory_space<vmem>>, vector<1x32xf32>,
    } else {
    }
    %c0 = arith.constant 0 : index
    %c0_1 = arith.constant 0 : index
    %3 = vector.load %arg1[%c0, %c0_1] : memref<16x32xbf16, #tpu.memory_space<vmem>>, vector<16x32xbf16>
    %4 = arith.extf %3 : vector<16x32xbf16> to vector<16x32xf32>
    %c0_2 = arith.constant 0 : index
    %c0_3 = arith.constant 0 : index
    %5 = vector.load %arg2[%c0_2, %c0_3] : memref<16x32xbf16, #tpu.memory_space<vmem>>, vector<16x32xbf16>
    %6 = arith.extf %5 : vector<16x32xbf16> to vector<16x32xf32>
    %c0_4 = arith.constant 0 : index
    %c0_5 = arith.constant 0 : index
    %7 = vector.load %arg3[%c0_4, %c0_5] : memref<16x1xf32, #tpu.memory_space<vmem>>, vector<16x1xf32>
    %8 = vector.broadcast %7 : vector<16x1xf32> to vector<16x32xf32>
    %9 = arith.mulf %8, %4 : vector<16x32xf32>
    %c0_6 = arith.constant 0 : index
    %c0_7 = arith.constant 0 : index
    %10 = vector.load %arg4[%c0_6, %c0_7] : memref<16x1xf32, #tpu.memory_space<vmem>>, vector<16x1xf32>
    %11 = vector.broadcast %10 : vector<16x1xf32> to vector<16x32xf32>
    %12 = arith.mulf %11, %6 : vector<16x32xf32>
    %13 = arith.addf %9, %12 : vector<16x32xf32>
    %14 = arith.truncf %13 : vector<16x32xf32> to vector<16x32xbf16>
    %c0_8 = arith.constant 0 : index
    %c0_9 = arith.constant 0 : index
    %15 = vector.load %arg7[%c0_8, %c0_9] : memref<32x32xbf16, #tpu.memory_space<vmem>>, vector<32x32xbf16>
    %cst = arith.constant dense<0.000000e+00> : vector<16x32xf32>
    %16 = tpu.matmul %14, %15, %cst {dimension_numbers = #tpu.dot_dimension_numbers<[1], [0], [0], [1], [0, 0, 1, 1], [], []>} : vector<16x32xbf16>, vector<32x32xbf16>, vector<16x32xf32> -> vector<16x32xf32>
    %c0_10 = arith.constant 0 : index
    %c0_11 = arith.constant 0 : index
    %17 = vector.load %arg5[%c0_10, %c0_11] : memref<16x1xf32, #tpu.memory_space<vmem>>, vector<16x1xf32>
    %c0_12 = arith.constant 0 : index
    %c0_13 = arith.constant 0 : index
    %18 = vector.load %arg8[%c0_12, %c0_13] : memref<1x32xf32, #tpu.memory_space<vmem>>, vector<1x32xf32>
    %19 = vector.broadcast %17 : vector<16x1xf32> to vector<16x32xf32>
    %20 = vector.broadcast %18 : vector<1x32xf32> to vector<16x32xf32>
    %21 = arith.mulf %19, %20 : vector<16x32xf32>
    %22 = arith.addf %16, %21 : vector<16x32xf32>
    %23 = math.tanh %22 : vector<16x32xf32>
    %24 = arith.subf %23, %6 : vector<16x32xf32>
    %c0_14 = arith.constant 0 : index
    %c0_15 = arith.constant 0 : index
    %25 = vector.load %arg6[%c0_14, %c0_15] : memref<16x1xf32, #tpu.memory_space<vmem>>, vector<16x1xf32>
    %26 = vector.broadcast %25 : vector<16x1xf32> to vector<16x32xf32>
    %27 = arith.mulf %24, %26 : vector<16x32xf32>
    %c0_16 = arith.constant 0 : index
    %c0_17 = arith.constant 0 : index
    %28 = vector.load %arg10[%c0_16, %c0_17] : memref<1x32xf32, #tpu.memory_space<vmem>>, vector<1x32xf32>
    %29 = arith.mulf %27, %27 : vector<16x32xf32>
    %cst_18 = arith.constant dense<0.000000e+00> : vector<32xf32>
    %30 = vector.multi_reduction <add>, %29, %cst_18 [0] : vector<16x32xf32> to vector<32xf32>
    %31 = vector.shape_cast %30 : vector<32xf32> to vector<1x32xf32>
    %32 = arith.addf %28, %31 : vector<1x32xf32>
    %c0_19 = arith.constant 0 : index
    %c0_20 = arith.constant 0 : index
    %33 = vector.load %arg10[%c0_19, %c0_20] : memref<1x32xf32, #tpu.memory_space<vmem>>, vector<1x32xf32>
    tpu.vector_store %arg10[%c0_19, %c0_20], %32 {strides = array<i32>} : memref<1x32xf32, #tpu.memory_space<vmem>>, vector<1x32xf32>,
    %c0_i32_21 = arith.constant 0 : i32
    %34 = arith.cmpi eq, %arg0, %c0_i32_21 : i32
    %35 = arith.extui %34 : i1 to i32
    %c0_i32_22 = arith.constant 0 : i32
    %36 = arith.cmpi ne, %35, %c0_i32_22 : i32
    scf.if %36 {
      %c0_23 = arith.constant 0 : index
      %c0_24 = arith.constant 0 : index
      %37 = vector.load %arg10[%c0_23, %c0_24] : memref<1x32xf32, #tpu.memory_space<vmem>>, vector<1x32xf32>
      %c0_25 = arith.constant 0 : index
      %c0_26 = arith.constant 0 : index
      %38 = vector.load %arg9[%c0_25, %c0_26] : memref<1x32xf32, #tpu.memory_space<vmem>>, vector<1x32xf32>
      tpu.vector_store %arg9[%c0_25, %c0_26], %37 {strides = array<i32>} : memref<1x32xf32, #tpu.memory_space<vmem>>, vector<1x32xf32>,
    } else {
    }
    return
  }
  func.func @transform_0(%arg0: i32) -> (i32, i32) {
    %c0_i32 = arith.constant 0 : i32
    %c0_i32_0 = arith.constant 0 : i32
    return %arg0, %c0_i32 : i32, i32
  }
  func.func @transform_1(%arg0: i32) -> (i32, i32) {
    %c0_i32 = arith.constant 0 : i32
    %c0_i32_0 = arith.constant 0 : i32
    return %arg0, %c0_i32 : i32, i32
  }
  func.func @transform_2(%arg0: i32) -> (i32, i32) {
    %c0_i32 = arith.constant 0 : i32
    %c0_i32_0 = arith.constant 0 : i32
    return %arg0, %c0_i32 : i32, i32
  }
  func.func @transform_3(%arg0: i32) -> (i32, i32) {
    %c0_i32 = arith.constant 0 : i32
    %c0_i32_0 = arith.constant 0 : i32
    return %arg0, %c0_i32 : i32, i32
  }
  func.func @transform_4(%arg0: i32) -> (i32, i32) {
    %c0_i32 = arith.constant 0 : i32
    %c0_i32_0 = arith.constant 0 : i32
    return %arg0, %c0_i32 : i32, i32
  }
  func.func @transform_5(%arg0: i32) -> (i32, i32) {
    %c0_i32 = arith.constant 0 : i32
    %c0_i32_0 = arith.constant 0 : i32
    return %arg0, %c0_i32 : i32, i32
  }
  func.func @transform_6(%arg0: i32) -> (i32, i32) {
    %c0_i32 = arith.constant 0 : i32
    %c0_i32_0 = arith.constant 0 : i32
    %c0_i32_1 = arith.constant 0 : i32
    return %c0_i32, %c0_i32_0 : i32, i32
  }
  func.func @transform_7(%arg0: i32) -> (i32, i32) {
    %c0_i32 = arith.constant 0 : i32
    %c0_i32_0 = arith.constant 0 : i32
    %c0_i32_1 = arith.constant 0 : i32
    return %c0_i32, %c0_i32_0 : i32, i32
  }
  func.func @transform_8(%arg0: i32) -> (i32, i32) {
    %c0_i32 = arith.constant 0 : i32
    %c0_i32_0 = arith.constant 0 : i32
    %c0_i32_1 = arith.constant 0 : i32
    return %c0_i32, %c0_i32_0 : i32, i32
  }
}

</mosaic_0001>

<bundles_post_ra>
// kernel: tpu_custom_call.1
= control target key start
LH: loop header
LB: loop body
LE: loop exit
PB: predicated region body
PF: predicated region fallthrough
CT: control target
= control target key end

     0   :  { %v267_v2 = vmov 0   ;;  %v268_v5 = vmov 0.0   ;;  %s364_s0 = inlined_call_operand.vmem [shape: bf16[16,32], index: 0, kind: input, shape index: {}]   ;;  %s365_s1 = inlined_call_operand.vmem [shape: bf16[16,32], index: 1, kind: input, shape index: {}]   ;;  %s366_s2 = inlined_call_operand.vmem [shape: f32[16,1], index: 2, kind: input, shape index: {}]   ;;  %s367_s3 = inlined_call_operand.vmem [shape: f32[16,1], index: 3, kind: input, shape index: {}]   ;;  %s368_s4 = inlined_call_operand.vmem [shape: f32[16,1], index: 4, kind: input, shape index: {}]   ;;  %s369_s5 = inlined_call_operand.vmem [shape: f32[16,1], index: 5, kind: input, shape index: {}]   ;;  %s370_s6 = inlined_call_operand.vmem [shape: bf16[32,32], index: 6, kind: input, shape index: {}]   ;;  %s371_s7 = inlined_call_operand.vmem [shape: f32[1,32], index: 7, kind: input, shape index: {}]   ;;  %s372_s8 = inlined_call_operand.hbm [shape: f32[1,32], index: 8, kind: output, shape index: {}]  }
   0x1   :  { %v59_v0 = vld [vmem:[%s367_s3] sm:$0xff]  ;;  %238 = vset.pattern.permute.xlu1 %v267_v2  ;;  %237 = vset.pattern.permute.xlu0 %v267_v2  ;;  %v60_v3 = vld [vmem:[%s367_s3 + $0x8] sm:$0xff] }
   0x2   :  { %v45_v1 = vld [vmem:[%s366_s2] sm:$0xff]  ;;  %63 = vperm.xlu1 %238, %v59_v0   ;;  %v46_v4 = vld [vmem:[%s366_s2 + $0x8] sm:$0xff]  ;;  %225 = vmatprep.subr.bf16.mxu0 %v268_v5 }
   0x3   :  { %49 = vperm.xlu0 %237, %v45_v1   ;;  %v239_v6 = vld [vmem:[%s370_s6 + $0x8] sm:$0xff]  }
   0x4   :  { %13 = vsyncpa [#allocation4], 0  ;;  %v81_v7 = vld [vmem:[%s368_s4 + $0x8] sm:$0xff]  ;;  %v80_v8 = vld [vmem:[%s368_s4] sm:$0xff]  ;;  %226 = vmatpush3.bf16.msra.mxu0 %v239_v6  ;;  %vm269_vm0 = vmmov 0   ;;  %vm113_vm1 = vcmask 261120  }
   0x5   :  { %v240_v9 = vld [vmem:[%s370_s6] sm:$0xff]   ;;  %229 = vmatprep.mubr.msk.bf16.mxu0 %vm269_vm0, %v268_v5  ;;  %227 = vmatprep.subr.bf16.mxu0 %v268_v5  ;;  %v163_v10 = vld [vmem:[%s369_s5 + $0x8] sm:$0xff]  ;;  %vm35_vm2 = vcmask 253952  }
   0x6   :  { %68 = vperm.xlu1 %238, %v60_v3   ;;  %v162_v11 = vld [vmem:[%s369_s5] sm:$0xff]  ;;  %36 = vst.msk [vmem:[#allocation2] sm:$0x1] %vm35_vm2, %v268_v5  ;;  %s270_s5 = smov [#allocation3]  }
   0x7   :  { %54 = vperm.xlu0 %237, %v46_v4   ;;  %v219_v12 = vld [vmem:[%s365_s1] sm:$0xff]  }
   0x8   :  { %228 = vmatpush3.bf16.msra.mxu0 %v240_v9  ;;  %v215_v13 = vld [vmem:[%s364_s0] sm:$0xff]   ;;  %v220_v14 = vunpack.c.l.bf16 %v219_v12  ;;  %v221_v18 = vunpack.c.h.bf16 %v219_v12 }
   0x9   :  { %v216_v15 = vunpack.c.l.bf16 %v215_v13  ;;  %v217_v19 = vunpack.c.h.bf16 %v215_v13  ;;  %v210_v29 = vld [vmem:[%s371_s7] ss:$0 sm:$0xff]  ;;  %s202_s7 = sshll.u32 %s270_s5, 4  ;;  %s203_s7 = int_to_ptr.vmem [resolvable:$true] %s202_s7 }
   0xa   :  { %90 = vperm.xlu1 %238, %v81_v7   ;;  %s245_s25 = scalar_lea.vmem %s203_s7, 16  ;;  %s249_s26 = scalar_lea.vmem %s203_s7, 32 }
   0xb   :  { %85 = vperm.xlu0 %237, %v80_v8   ;;  %p246_p0 = scmp.ne.s32.totalorder %s203_s7, %s245_s25  ;;  %p250_p1 = scmp.lt.s32.totalorder %s203_s7, %s203_s7 }
   0xc   :  { %p251_p2 = scmp.lt.s32.totalorder %s249_s26, %s245_s25 }
   0xd   :  { %v176_v58 = vld [vmem:[#allocation2] sm:$0x1] }
   0xe   :  { %171 = vperm.xlu1 %238, %v163_v10   ;;  %p252_p3 = por %p251_p2, %p250_p1 }
   0xf   :  { %166 = vperm.xlu0 %237, %v162_v11  }
  0x10   :  { %p253_p4 = pnand %p252_p3, %p246_p0 }
  0x7d   :  { %v64_v16 = vpop.permute.xlu1 %63 }
  0x7e   :  { %v50_v17 = vpop.permute.xlu0 %49  ;;  %v71_v20 = vmul.f32 %v220_v14, %v64_v16 }
  0x7f   :  { %v57_v21 = vmul.f32 %v216_v15, %v50_v17 }
  0x81   :  { %v69_v22 = vpop.permute.xlu1 %68  ;;  %v73_v26 = vadd.f32 %v71_v20, %v57_v21 }
  0x82   :  { %v55_v23 = vpop.permute.xlu0 %54  ;;  %v72_v24 = vmul.f32 %v221_v18, %v69_v22 }
  0x83   :  { %v58_v25 = vmul.f32 %v217_v19, %v55_v23 }
  0x85   :  { %v74_v27 = vadd.f32 %v72_v24, %v58_v25  ;;  %v91_v32 = vpop.permute.xlu1 %90 }
  0x86   :  { %v86_v30 = vpop.permute.xlu0 %85  ;;  %v100_v36 = vmul.f32 %v210_v29, %v91_v32 }
  0x87   :  { %v75_v28 = vpack.c.bf16 %v74_v27, %v73_v26  ;;  %v99_v31 = vmul.f32 %v210_v29, %v86_v30 }
  0x89   :  { %230 = vmatmul.mubr.msk.bf16.vlgmr.msra.gmra.mxu0 %vm113_vm1, %v75_v28  ;;  %v172_v46 = vpop.permute.xlu1 %171 }
  0x8a   :  { %v167_v42 = vpop.permute.xlu0 %166 }
 0x149   :  { %v151_v33 = vpop.f32.mrf.mxu0 }
 0x14a   :  { %v152_v34 = vadd.f32 %v151_v33, %v99_v31 }
 0x14b   :  { %v231_v35 = vpop.f32.mrf.mxu0 }
 0x14c   :  { %241 = vtanh.f32 %v152_v34 }
 0x14d   :  { %v154_v37 = vpop.f32.mrf.mxu0 }
 0x14e   :  { %v155_v38 = vadd.f32 %v154_v37, %v100_v36 }
 0x14f   :  { %v232_v39 = vpop.f32.mrf.mxu0 }
 0x150   :  { %243 = vtanh.f32 %v155_v38 }
 0x159   :  { %v242_v40 = vpop.eup %241 }
 0x15a   :  { %v160_v41 = vsub.f32 %v242_v40, %v220_v14 }
 0x15c   :  { %v174_v43 = vmul.f32 %v167_v42, %v160_v41 }
 0x15d   :  { %v244_v44 = vpop.eup %243 }
 0x15e   :  { %v161_v45 = vsub.f32 %v244_v44, %v221_v18  ;;  %v177_v47 = vmul.f32 %v174_v43, %v174_v43 }
 0x160   :  { %v175_v48 = vmul.f32 %v172_v46, %v161_v45  ;;  %v179_v50 = vsel %vm113_vm1, %v177_v47, 0.0 }
 0x162   :  { %v178_v49 = vmul.f32 %v175_v48, %v175_v48 }
 0x164   :  { %v180_v51 = vsel %vm113_vm1, %v178_v49, 0.0 }
 0x165   :  { %v181_v52 = vadd.f32 %v180_v51, %v179_v50 }
 0x167   :  { %v182_v53 = vrot.slane %v181_v52, 4 }
 0x169   :  { %v183_v54 = vadd.f32 %v182_v53, %v181_v52 }
 0x16b   :  { %v184_v55 = vrot.slane %v183_v54, 2 }
 0x16d   :  { %v185_v56 = vadd.f32 %v184_v55, %v183_v54 }
 0x16f   :  { %v186_v57 = vrot.slane %v185_v56, 1 }
 0x171   :  { %v187_v59 = vadd.f32 %v186_v57, %v185_v56 }
 0x173   :  { %v188_v60 = vadd.f32 %v187_v59, %v176_v58 }
 0x175   :  { %190 = vst.msk [vmem:[#allocation2] sm:$0x1] %vm35_vm2, %v188_v60 }
 0x17c   :  { %v194_v61 = vld [vmem:[#allocation2] sm:$0x1] }
 0x17d   :  { %195 = vst.msk [vmem:[#allocation3] sm:$0x1] %vm35_vm2, %v194_v61 }
 0x17e   :  { %256 = shalt.err (!%p253_p4)
}
 0x17f   :  { %205 = dma.vmem_to_hbm [thread:$0]  %s203_s7, 16, %s372_s8, [#allocation4]  }
 0x180   :  { %265 = dma.done.wait [#allocation4], 16  }
 0x181   :  { %266 = vsyncadd [#allocation4], 4294967280 }
 0x182   :  { %209 = vsyncpa [#allocation4], 1 }

</bundles_post_ra>
